<compile_context>
chip_gen: v6e
topology: v6e:2x2x1
jax: 0.10.0
libtpu: 0.0.40
codegen_flags: <defaults>
</compile_context>

<pallas_src>
import functools
import inspect

import jax
import jax.numpy as jnp
from jax.experimental import pallas as pl
from jax.experimental.pallas import tpu as pltpu


# ---------------------------------------------------------------------------
# helpers
# ---------------------------------------------------------------------------
try:
    _HAS_PIPELINE_MODE = (
        "pipeline_mode" in inspect.signature(pl.BlockSpec).parameters
        and hasattr(pl, "Buffered")
    )
except (TypeError, ValueError):  # pragma: no cover - odd jax builds
    _HAS_PIPELINE_MODE = False


def _const_spec(block_shape):
    """BlockSpec for an operand whose block never changes across the grid."""
    index_map = lambda *_: (0,) * len(block_shape)
    if _HAS_PIPELINE_MODE:
        # constant block -> no need to double-buffer it; saves VMEM (esp. v7x).
        return pl.BlockSpec(block_shape, index_map, pipeline_mode=pl.Buffered(1))
    return pl.BlockSpec(block_shape, index_map)


def _pad_to_multiple(n, m):
    return ((n + m - 1) // m) * m


# ---------------------------------------------------------------------------
# kernel: one grid step = `gb` (batch, variable) slabs fused into 2 big matmuls
# ---------------------------------------------------------------------------
def _make_fc2_kernel(gb, tn, patch_len, d_model):
    def kernel(x_ref, w1t_ref, b1_ref, w2t_ref, b2_ref, o_ref):
        # x_ref  : (gb, patch_len, tn)        w1t_ref: (patch_len, d_model)
        # b*_ref : (1, d_model) f32           w2t_ref: (d_model, d_model)
        # o_ref  : (gb, d_model, tn)
        #
        # 1) present the block as one (gb*tn, patch_len) matrix.  The minor-dims
        #    transpose is done in f32 (most robust Mosaic path) and its XLU cost
        #    hides under the HBM DMA of the (much larger) output block.
        xt = jnp.swapaxes(x_ref[...].astype(jnp.float32), 1, 2)      # (gb, tn, p)
        x2 = xt.reshape(gb * tn, patch_len).astype(w1t_ref.dtype)    # (gb*tn, p)

        # 2) two big MXU matmuls (M = gb*tn), f32 accumulate, f32 bias + ReLU.
        z = jnp.dot(x2, w1t_ref[...], preferred_element_type=jnp.float32)
        z = jnp.maximum(z + b1_ref[...], 0.0)                        # (gb*tn, d) f32
        y = jnp.dot(z.astype(w2t_ref.dtype), w2t_ref[...],
                    preferred_element_type=jnp.float32)
        y = y + b2_ref[...]                                          # (gb*tn, d) f32

        # 3) back to the native output layout, one whole-block store.
        y3 = y.reshape(gb, tn, d_model)                              # (gb, tn, d)
        o_ref[...] = jnp.swapaxes(y3, 1, 2).astype(o_ref.dtype)      # (gb, d, tn)

    return kernel


# ---------------------------------------------------------------------------
# wrapper
# ---------------------------------------------------------------------------
@functools.partial(jax.jit, static_argnames=("mxu_dtype",))
def fc2_encoder_forward(x, w1, b1, w2, b2, *, mxu_dtype=None):
    """x: [bs, n_vars, patch_len, num_patch] -> [bs, n_vars, d_model, num_patch].

    mxu_dtype: optionally cast x/W1/W2 (e.g. jnp.bfloat16) for the MXU.  This is
    beneficial on every generation (incl. v5e, whose MXU is bf16-native); the
    accumulate and bias/ReLU epilogue stay f32 and the output keeps x's dtype.
    """
    bs, n_vars, patch_len, num_patch = x.shape
    d_model = w1.shape[0]
    out_dtype = x.dtype

    if mxu_dtype is not None:
        x = x.astype(mxu_dtype)
        w1 = w1.astype(mxu_dtype)
        w2 = w2.astype(mxu_dtype)

    # weights pre-transposed (tiny one-time XLA op), biases as f32 rows.
    w1t = jnp.transpose(w1)                       # (patch_len, d_model)
    w2t = jnp.transpose(w2)                       # (d_model, d_model)
    b1r = b1.astype(jnp.float32).reshape(1, d_model)
    b2r = b2.astype(jnp.float32).reshape(1, d_model)

    # free reshape: collapse (bs, n_vars) -> B.  No HBM permutes anywhere.
    B = bs * n_vars
    x3 = x.reshape(B, patch_len, num_patch)

    # pad num_patch / patch_len to sublane multiples so the in-kernel
    # (gb, tn, .) <-> (gb*tn, .) reshapes and minor-dims transposes are clean
    # re-tilings.  Zero-padding is mathematically exact; padded output columns
    # are sliced off at the end.  (Only happens for odd shapes.)
    num_patch_p = _pad_to_multiple(num_patch, 8)
    patch_len_p = _pad_to_multiple(patch_len, 8)
    if num_patch_p != num_patch or patch_len_p != patch_len:
        x3 = jnp.pad(x3, ((0, 0), (0, patch_len_p - patch_len),
                          (0, num_patch_p - num_patch)))
        w1t = jnp.pad(w1t, ((0, patch_len_p - patch_len), (0, 0)))

    in_bpe = jnp.dtype(x3.dtype).itemsize
    out_bpe = jnp.dtype(out_dtype).itemsize
    w_bpe = jnp.dtype(w1t.dtype).itemsize

    # --- generation-aware VMEM budget -------------------------------------
    try:
        vmem_cap = int(pltpu.get_tpu_info().vmem_capacity_bytes)
    except Exception:
        vmem_cap = 64 << 20                       # conservative (v7x per-TC)
    big_vmem = vmem_cap >= (100 << 20)            # v5e / v6e: 128 MiB
    act_budget = (28 << 20) if big_vmem else (12 << 20)
    vmem_req_cap = (100 << 20) if big_vmem else (46 << 20)

    def step_bytes(gb_, tn_):
        blk_in = gb_ * patch_len_p * tn_ * in_bpe
        blk_out = gb_ * d_model * tn_ * out_bpe
        # in-kernel f32 intermediates (transposed x, z, y, transposed y, casts)
        interm = gb_ * tn_ * 4 * (2 * patch_len_p + 4 * d_model)
        return 2 * (blk_in + blk_out) + interm    # blocks are double-buffered

    # num_patch tile: whole axis unless even a single slab blows the budget
    # (keeps every block one fully contiguous DMA).
    tn = num_patch_p
    if step_bytes(1, tn) > act_budget:
        fits = [d for d in range(tn, 0, -1)
                if tn % d == 0 and d % 128 == 0 and step_bytes(1, d) <= act_budget]
        if fits:
            tn = fits[0]
    np_tiles = num_patch_p // tn

    # gb: largest divisor of B inside the budget, preferring a grid that is
    # >= 8 steps and even (v7x: 2 TensorCores; all: pipelining depth), then
    # >= 4 steps, then just the biggest that fits.
    max_gb = 1
    for d in range(1, B + 1):
        if B % d == 0 and step_bytes(d, tn) <= act_budget:
            max_gb = d
    divs = [d for d in range(1, max_gb + 1) if B % d == 0]
    gb = divs[-1]
    for pred in (lambda g: (B // g) >= 8 and (B // g) % 2 == 0,
                 lambda g: (B // g) >= 4):
        cands = [d for d in divs if pred(d)]
        if cands:
            gb = cands[-1]
            break
    grid = (B // gb, np_tiles)

    # explicit VMEM request: blocks (double-buffered) + weights (single- or
    # double-buffered) + Mosaic scratch margin — counted once, no 2x over-ask.
    w_mult = 1 if _HAS_PIPELINE_MODE else 2
    w_bytes = (patch_len_p * d_model + d_model * d_model) * w_bpe + 2 * d_model * 4
    est = step_bytes(gb, tn) + w_mult * w_bytes + (4 << 20)
    vmem_limit = int(min(max(est, 32 << 20), vmem_req_cap))

    out3 = pl.pallas_call(
        _make_fc2_kernel(gb, tn, patch_len_p, d_model),
        out_shape=jax.ShapeDtypeStruct((B, d_model, num_patch_p), out_dtype),
        grid_spec=pltpu.PrefetchScalarGridSpec(
            num_scalar_prefetch=0,
            grid=grid,
            in_specs=[
                pl.BlockSpec((gb, patch_len_p, tn), lambda i, j: (i, 0, j)),
                _const_spec((patch_len_p, d_model)),
                _const_spec((1, d_model)),
                _const_spec((d_model, d_model)),
                _const_spec((1, d_model)),
            ],
            out_specs=pl.BlockSpec((gb, d_model, tn), lambda i, j: (i, 0, j)),
        ),
        compiler_params=pltpu.CompilerParams(
            dimension_semantics=("parallel", "parallel"),
            vmem_limit_bytes=vmem_limit,
        ),
    )(x3, w1t, b1r, w2t, b2r)

    if num_patch_p != num_patch:
        out3 = out3[:, :, :num_patch]
    return out3.reshape(bs, n_vars, d_model, num_patch)


# ---------------------------------------------------------------------------
# pure-JAX reference (mirrors the PyTorch module literally)
# ---------------------------------------------------------------------------
def _reference(x, w1, b1, w2, b2):
    hp = jax.lax.Precision.HIGHEST
    xp = jnp.transpose(x, (0, 3, 1, 2))                      # [bs, np, nv, pl]
    z = jnp.maximum(jnp.einsum("bnvp,dp->bnvd", xp, w1, precision=hp) + b1, 0.0)
    y = jnp.einsum("bnvd,ed->bnve", z, w2, precision=hp) + b2
    y = jnp.swapaxes(y, 1, 2)                                # transpose(1,2)
    return jnp.transpose(y, (0, 1, 3, 2))                    # [bs, nv, d, np]


# ---------------------------------------------------------------------------
# self-test
# ---------------------------------------------------------------------------
def _run_case(bs, n_vars, patch_len, num_patch, d_model, seed,
              mxu_dtype=None, tol=5e-3, name=""):
    key = jax.random.fold_in(jax.random.PRNGKey(0), seed)
    kx, k1, k2, k3, k4 = jax.random.split(key, 5)
    x = jax.random.normal(kx, (bs, n_vars, patch_len, num_patch), jnp.float32)
    # PyTorch Linear weight layout: [out_features, in_features]
    w1 = jax.random.normal(k1, (d_model, patch_len), jnp.float32) * 0.1
    b1 = jax.random.normal(k2, (d_model,), jnp.float32) * 0.1
    w2 = jax.random.normal(k3, (d_model, d_model), jnp.float32) * 0.1
    b2 = jax.random.normal(k4, (d_model,), jnp.float32) * 0.1

    ref = _reference(x, w1, b1, w2, b2)
    out = jax.block_until_ready(
        fc2_encoder_forward(x, w1, b1, w2, b2, mxu_dtype=mxu_dtype))
    assert out.shape == (bs, n_vars, d_model, num_patch), (name, out.shape)
    assert out.dtype == x.dtype, (name, out.dtype)
    assert jnp.allclose(out, ref, atol=tol, rtol=tol), f"{name}: mismatch vs reference"


if __name__ == "__main__":
    # small shapes consistent with the module: bs=2, n_vars(c_in)=4,
    # patch_len=16, num_patch=8, d_model=32
    _run_case(2, 4, 16, 8, 32, seed=1, name="f32_small")
    # larger B exercises the gb>1 fused-batch path
    _run_case(4, 8, 16, 8, 32, seed=2, name="f32_batched")
    # bf16 MXU operands (recommended on all generations; f32 accumulate/epilogue)
    _run_case(2, 4, 16, 8, 32, seed=1, mxu_dtype=jnp.bfloat16, tol=5e-2,
              name="bf16_small")

    # TODO(synk): non-shared-embedding branch (per-variable nn.Linear lists) is not
    # implemented; the module defaults to shared_embedding=True.
    print("KERNEL_OK")
</pallas_src>

<mosaic_0001>
module attributes {stable_mosaic.version = 11 : i64} {
  func.func @kernel(%arg0: i32, %arg1: i32, %arg2: memref<1x16x8xf32, #tpu.memory_space<vmem>>, %arg3: memref<16x32xf32, #tpu.memory_space<vmem>>, %arg4: memref<1x32xf32, #tpu.memory_space<vmem>>, %arg5: memref<32x32xf32, #tpu.memory_space<vmem>>, %arg6: memref<1x32xf32, #tpu.memory_space<vmem>>, %arg7: memref<1x32x8xf32, #tpu.memory_space<vmem>>) attributes {dimension_semantics = [#tpu.dimension_semantics<parallel>, #tpu.dimension_semantics<parallel>], iteration_bounds = array<i64: 8, 1>, scalar_prefetch = 0 : i64, scratch_operands = 0 : i64, tpu.core_type = #tpu.core_type<tc>, window_params = [{transform_indices = @transform_0, window_bounds = array<i64: 1, 16, 8>}, {pipeline_mode = #tpu.pipeline_mode<synchronous>, transform_indices = @transform_1, window_bounds = array<i64: 16, 32>}, {pipeline_mode = #tpu.pipeline_mode<synchronous>, transform_indices = @transform_2, window_bounds = array<i64: 1, 32>}, {pipeline_mode = #tpu.pipeline_mode<synchronous>, transform_indices = @transform_3, window_bounds = array<i64: 32, 32>}, {pipeline_mode = #tpu.pipeline_mode<synchronous>, transform_indices = @transform_4, window_bounds = array<i64: 1, 32>}, {transform_indices = @transform_5, window_bounds = array<i64: 1, 32, 8>}]} {
    %c0 = arith.constant 0 : index
    %c0_0 = arith.constant 0 : index
    %c0_1 = arith.constant 0 : index
    %0 = vector.load %arg2[%c0, %c0_0, %c0_1] : memref<1x16x8xf32, #tpu.memory_space<vmem>>, vector<1x16x8xf32>
    %1 = tpu.transpose %0, [0, 2, 1] : vector<1x16x8xf32> -> vector<1x8x16xf32>
    %2 = vector.shape_cast %1 : vector<1x8x16xf32> to vector<8x16xf32>
    %c0_2 = arith.constant 0 : index
    %c0_3 = arith.constant 0 : index
    %3 = vector.load %arg3[%c0_2, %c0_3] : memref<16x32xf32, #tpu.memory_space<vmem>>, vector<16x32xf32>
    %cst = arith.constant dense<0.000000e+00> : vector<8x32xf32>
    %4 = tpu.matmul %2, %3, %cst {dimension_numbers = #tpu.dot_dimension_numbers<[1], [0], [0], [1], [0, 0, 1, 1], [], []>} : vector<8x16xf32>, vector<16x32xf32>, vector<8x32xf32> -> vector<8x32xf32>
    %c0_4 = arith.constant 0 : index
    %c0_5 = arith.constant 0 : index
    %5 = vector.load %arg4[%c0_4, %c0_5] : memref<1x32xf32, #tpu.memory_space<vmem>>, vector<1x32xf32>
    %6 = vector.broadcast %5 : vector<1x32xf32> to vector<8x32xf32>
    %7 = arith.addf %4, %6 : vector<8x32xf32>
    %cst_6 = arith.constant 0.000000e+00 : f32
    %8 = vector.broadcast %cst_6 : f32 to vector<8x32xf32>
    %9 = arith.maximumf %7, %8 : vector<8x32xf32>
    %c0_7 = arith.constant 0 : index
    %c0_8 = arith.constant 0 : index
    %10 = vector.load %arg5[%c0_7, %c0_8] : memref<32x32xf32, #tpu.memory_space<vmem>>, vector<32x32xf32>
    %cst_9 = arith.constant dense<0.000000e+00> : vector<8x32xf32>
    %11 = tpu.matmul %9, %10, %cst_9 {dimension_numbers = #tpu.dot_dimension_numbers<[1], [0], [0], [1], [0, 0, 1, 1], [], []>} : vector<8x32xf32>, vector<32x32xf32>, vector<8x32xf32> -> vector<8x32xf32>
    %c0_10 = arith.constant 0 : index
    %c0_11 = arith.constant 0 : index
    %12 = vector.load %arg6[%c0_10, %c0_11] : memref<1x32xf32, #tpu.memory_space<vmem>>, vector<1x32xf32>
    %13 = vector.broadcast %12 : vector<1x32xf32> to vector<8x32xf32>
    %14 = arith.addf %11, %13 : vector<8x32xf32>
    %15 = vector.shape_cast %14 : vector<8x32xf32> to vector<1x8x32xf32>
    %16 = tpu.transpose %15, [0, 2, 1] : vector<1x8x32xf32> -> vector<1x32x8xf32>
    %c0_12 = arith.constant 0 : index
    %c0_13 = arith.constant 0 : index
    %c0_14 = arith.constant 0 : index
    %17 = vector.load %arg7[%c0_12, %c0_13, %c0_14] : memref<1x32x8xf32, #tpu.memory_space<vmem>>, vector<1x32x8xf32>
    tpu.vector_store %arg7[%c0_12, %c0_13, %c0_14], %16 {strides = array<i32>} : memref<1x32x8xf32, #tpu.memory_space<vmem>>, vector<1x32x8xf32>,
    return
  }
  func.func @transform_0(%arg0: i32, %arg1: i32) -> (i32, i32, i32) {
    %c0_i32 = arith.constant 0 : i32
    %c0_i32_0 = arith.constant 0 : i32
    return %arg0, %c0_i32, %arg1 : i32, i32, i32
  }
  func.func @transform_1(%arg0: i32, %arg1: i32) -> (i32, i32) {
    %c0_i32 = arith.constant 0 : i32
    %c0_i32_0 = arith.constant 0 : i32
    %c0_i32_1 = arith.constant 0 : i32
    return %c0_i32, %c0_i32_0 : i32, i32
  }
  func.func @transform_2(%arg0: i32, %arg1: i32) -> (i32, i32) {
    %c0_i32 = arith.constant 0 : i32
    %c0_i32_0 = arith.constant 0 : i32
    %c0_i32_1 = arith.constant 0 : i32
    return %c0_i32, %c0_i32_0 : i32, i32
  }
  func.func @transform_3(%arg0: i32, %arg1: i32) -> (i32, i32) {
    %c0_i32 = arith.constant 0 : i32
    %c0_i32_0 = arith.constant 0 : i32
    %c0_i32_1 = arith.constant 0 : i32
    return %c0_i32, %c0_i32_0 : i32, i32
  }
  func.func @transform_4(%arg0: i32, %arg1: i32) -> (i32, i32) {
    %c0_i32 = arith.constant 0 : i32
    %c0_i32_0 = arith.constant 0 : i32
    %c0_i32_1 = arith.constant 0 : i32
    return %c0_i32, %c0_i32_0 : i32, i32
  }
  func.func @transform_5(%arg0: i32, %arg1: i32) -> (i32, i32, i32) {
    %c0_i32 = arith.constant 0 : i32
    %c0_i32_0 = arith.constant 0 : i32
    return %arg0, %c0_i32, %arg1 : i32, i32, i32
  }
}

</mosaic_0001>

<bundles_post_ra>
// kernel: fc2_encoder_forward.1
= control target key start
LH: loop header
LB: loop body
LE: loop exit
PB: predicated region body
PF: predicated region fallthrough
CT: control target
= control target key end

     0   :  { %s704_s18 = smov 0   ;;  %s706_s19 = smov 0   ;;  %s765_s0 = inlined_call_operand.vmem [shape: f32[8,16,8], index: 0, kind: input, shape index: {}]   ;;  %s766_s1 = inlined_call_operand.vmem [shape: f32[16,32], index: 1, kind: input, shape index: {}]   ;;  %s767_s2 = inlined_call_operand.vmem [shape: f32[1,32], index: 2, kind: input, shape index: {}]   ;;  %s768_s3 = inlined_call_operand.vmem [shape: f32[32,32], index: 3, kind: input, shape index: {}]   ;;  %s769_s4 = inlined_call_operand.vmem [shape: f32[1,32], index: 4, kind: input, shape index: {}]   ;;  %s770_s5 = inlined_call_operand.vmem [shape: f32[8,32,8], index: 5, kind: output, shape index: {}]  }
   0x1   :  { %s708_s20 = smov 0  }
   0x2 LB: > { %s27_s21 = sadd.s32 1, %s666_s19  ;;  %p583_p0 = scmp.ge.s32.totalorder %s670_s20, 1  ;;  %s670_s20 = sphi %s708_s20, %s15_s20   ;;  %s666_s19 = sphi %s706_s19, %s772_s19   ;;  %s662_s18 = sphi %s704_s18, %s771_s18  }
   0x3   : > { %p29_p1 = scmp.ge.s32.totalorder %s27_s21, 8  ;;  %p206_p2 = scmp.lt.s32.totalorder %s670_s20, 9 }
   0x5   : > { %s774_s21 = smov (%p29_p1, %s27_s21), 0  ;;  %p207_p3 = pnand %p583_p0, %p206_p2 }
   0x6   : > { %p240_p4 = scmp.lt.s32.totalorder (!%p207_p3), %s662_s18, 7 }
   0x7   : > { %210 = sbr.rel (%p207_p3) target bundleno = 672 (0x2a0), region = 40 }
   0xc   : > { %v291_v0 = vld [vmem:[%s766_s1 + $0x8] sm:$0xff]  ;;  %v672_v1 = vmov 0.0   ;;  %v290_v2 = vld [vmem:[%s766_s1] sm:$0xff]  ;;  %vm673_vm0 = vmmov 0   ;;  %s776_s18 = smov (!%p240_p4, %s662_s18), 7  ;;  %v377_v3 = vld [vmem:[%s768_s3 + $0x18] sm:$0xff] }
   0xd   : > { %604 = vmatprep.subr.mxu0 %v672_v1  ;;  %608 = vmatprep.mubr.msk.f32.mxu0 %vm673_vm0, %v672_v1  ;;  %s594_s26 = sshll.u32 %s776_s18, 4  ;;  %vm299_vm1 = vcmask 130048   ;;  %v376_v7 = vld [vmem:[%s768_s3 + $0x10] sm:$0xff]  ;;  %v375_v8 = vld [vmem:[%s768_s3 + $0x8] sm:$0xff]  ;;  %v374_v9 = vld [vmem:[%s768_s3] sm:$0xff]  ;;  %vm385_vm2 = vcmask 261120  }
   0xe   : > { %605 = vmatpush3.msra.mxu0 %v291_v0  ;;  %611 = vmatprep.subr.mxu1 %v672_v1  ;;  %s247_s6 = scalar_lea.vmem %s765_s0, %s594_s26  ;;  %v588_v10 = vld [vmem:[%s767_s2] ss:$0 sm:$0xff]  ;;  %s595_s17 = sshll.u32 %s776_s18, 5  ;;  %vm491_vm3 = vcmask 64512  }
   0xf   : > { %606 = vmatprep.subr.mxu0 %v672_v1  ;;  %619 = vmatprep.mubr.msk.f32.mxu1 %vm673_vm0, %v672_v1  ;;  %v256_v4 = vld [vmem:[%s247_s6] sm:$0xff]  ;;  %v257_v5 = vld [vmem:[%s247_s6 + $0x8] sm:$0xff]  ;;  %s255_s24 = scalar_lea.vmem %s770_s5, %s595_s17 }
  0x10   : > { %607 = vmatpush3.msra.mxu0 %v290_v2  ;;  %612 = vmatpush3.msra.mxu1 %v377_v3  ;;  %v590_v15 = vld [vmem:[%s769_s4] ss:$0 sm:$0xff] }
  0x11   : > { %613 = vmatprep.subr.mxu1 %v672_v1  ;;  %258 = vxpose.xlu0.b32.start [1/2] (short) (narrow) %v256_v4, 8 }
  0x12   : > { %614 = vmatpush3.msra.mxu1 %v376_v7 }
  0x13   : > { %615 = vmatprep.subr.mxu1 %v672_v1 }
  0x14   : > { %616 = vmatpush3.msra.mxu1 %v375_v8 }
  0x15   : > { %259 = vxpose.xlu0.b32.end [2/2] (short) (narrow) %v257_v5, 8  ;;  %617 = vmatprep.subr.mxu1 %v672_v1 }
  0x16   : > { %618 = vmatpush3.msra.mxu1 %v374_v9 }
  0x8d   : > { %v274_v6 = vpop.trf.xlu0 }
  0x8e   : > { %609 = vmatmul.mubr.msk.f32.vlgmr.msra.gmra.mxu0 %vm299_vm1, %v274_v6 }
 0x14e   : > { %v369_v11 = vpop.f32.mrf.mxu0 }
 0x14f   : > { %v370_v12 = vadd.f32 %v588_v10, %v369_v11 }
 0x150   : > { %v610_v13 = vpop.f32.mrf.mxu0 }
 0x151   : > { %v373_v14 = vmax.f32 %v370_v12, 0.0 }
 0x153   : > { %620 = vmatmul.mubr.msk.f32.vlgmr.msra.gmra.mxu1 %vm385_vm2, %v373_v14 }
 0x213   : > { %v455_v16 = vpop.f32.mrf.mxu1 }
 0x214   : > { %v456_v17 = vadd.f32 %v590_v15, %v455_v16 }
 0x215   : > { %v621_v18 = vpop.f32.mrf.mxu1 }
 0x216   : > { %459 = vxpose.xlu1.b32.start.end [1/1] (short) (narrow) %v456_v17, 32 }
 0x292   : > { %v475_v19 = vpop.trf.xlu1 }
 0x293   : > { %492 = vst.msk [vmem:[%s255_s24] sm:$0xff] %vm491_vm3, %v475_v19 }
 0x296   : > { %v476_v20 = vpop.trf.xlu1 }
 0x297   : > { %493 = vst.msk [vmem:[%s255_s24 + $0x8] sm:$0xff] %vm491_vm3, %v476_v20 }
 0x29a   : > { %v477_v21 = vpop.trf.xlu1 }
 0x29b   : > { %494 = vst.msk [vmem:[%s255_s24 + $0x10] sm:$0xff] %vm491_vm3, %v477_v21 }
 0x29e   : > { %v478_v22 = vpop.trf.xlu1 }
 0x29f   : > { %495 = vst.msk [vmem:[%s255_s24 + $0x18] sm:$0xff] %vm491_vm3, %v478_v22 }
 0x2a0 PF: > { %s15_s20 = sadd.s32 1, %s670_s20   ;;  %s771_s18 = smov %s666_s19 }
 0x2a1   : > { %p12_p5 = scmp.ge.s32.totalorder %s15_s20, 10   ;;  %s772_s19 = smov %s774_s21 }
 0x2a3   :  { %14 = sbr.rel (!%p12_p5) target bundleno = 2 (0x2), region = 70 }

</bundles_post_ra>
